<compile_context>
chip_gen: v7x
topology: tpu7x:2x2x1
jax: 0.10.0
libtpu: 0.0.40
codegen_flags: <defaults>
</compile_context>

<pallas_src>
import jax
import jax.numpy as jnp
from jax.experimental import pallas as pl
from jax.experimental.pallas import tpu as pltpu


# Widest-first lane-dim candidates (all multiples of 128).
_LANE_CANDIDATES = (4096, 2048, 1024, 512, 256, 128)
# Target ~2 MiB of f32 per block (512 * 1024 elements).
_TARGET_BLOCK_ELEMS = 512 * 1024
# Ragged inputs up to this many elements are handled as a single full block
# (<= ~8 MiB of f32 with double-buffered in + out), avoiding pad/slice passes.
_SINGLE_BLOCK_MAX_ELEMS = 512 * 1024


def _make_constant_scalar_kernel(factor, bias):
    # factor / bias are compile-time Python constants baked into the kernel.
    def kernel(x_ref, o_ref):
        o_ref[...] = (x_ref[...] * factor + bias).astype(o_ref.dtype)

    return kernel


def _launch(x2d, block_shape, grid, constant, bias, out_dtype):
    rows, cols = x2d.shape
    return pl.pallas_call(
        _make_constant_scalar_kernel(constant, bias),
        out_shape=jax.ShapeDtypeStruct((rows, cols), out_dtype),
        grid=grid,
        in_specs=[pl.BlockSpec(block_shape, lambda i: (i, 0))],
        out_specs=pl.BlockSpec(block_shape, lambda i: (i, 0)),
        compiler_params=pltpu.CompilerParams(
            dimension_semantics=("parallel",),
        ),
    )(x2d)


def constant_scalar(x, constant=1.0, bias=0.0):
    """y = constant * x + bias, elementwise (ConstantScalar.forward)."""
    orig_shape = x.shape

    # Match PyTorch-style type promotion (float scalar * int tensor -> float);
    # Python scalars are weakly typed so float inputs keep their dtype.
    out_dtype = jnp.result_type(x, constant, bias)
    x = x.astype(out_dtype)

    n = x.size
    if n == 0:
        return jnp.zeros(orig_shape, out_dtype)

    # Fast path: widest lane dim (multiple of 128, <= 4096) that divides n
    # exactly -> contiguous reshape only, no pad/slice HBM round-trips.
    cols = None
    for c in _LANE_CANDIDATES:
        if n % c == 0:
            cols = c
            break

    x_flat = x.reshape(-1)

    if cols is None:
        if n <= _SINGLE_BLOCK_MAX_ELEMS:
            # Small ragged input: one full-array block (block == full dims is
            # always legal), no pad / slice extra HBM passes.
            x2d = x_flat.reshape(1, n)
            out2d = _launch(x2d, (1, n), (1,), constant, bias, out_dtype)
            return out2d.reshape(orig_shape)
        # Large ragged input: pad the flat array up to a multiple of a wide
        # lane dim, process, then slice the valid prefix back out.
        cols = 1024
        n_pad = pl.cdiv(n, cols) * cols
        x_flat = jnp.pad(x_flat, (0, n_pad - n))
        padded = True
    else:
        n_pad = n
        padded = False

    rows = n_pad // cols
    x2d = x_flat.reshape(rows, cols)

    # Block rows: ~2 MiB blocks, sublane dim a multiple of 8 (or the full row
    # count when the slab is small, which is always legal).
    max_rows = max(8, (_TARGET_BLOCK_ELEMS // cols) // 8 * 8)
    block_rows = rows if rows <= max_rows else max_rows
    grid = (pl.cdiv(rows, block_rows),)

    out2d = _launch(x2d, (block_rows, cols), grid, constant, bias, out_dtype)

    if padded:
        return out2d.reshape(-1)[:n].reshape(orig_shape)
    return out2d.reshape(orig_shape)


if __name__ == "__main__":
    key = jax.random.PRNGKey(0)

    factor = 2.5
    bias = 0.75

    # NCHW-style input, small shape (fast path: 2*4*16*16 = 2048 divides by 2048).
    x = jax.random.normal(key, (2, 4, 16, 16), dtype=jnp.float32)
    y = jax.block_until_ready(constant_scalar(x, constant=factor, bias=bias))
    y_ref = factor * x + bias
    assert y.shape == x.shape and y.dtype == x.dtype
    assert jnp.allclose(y, y_ref, atol=1e-6, rtol=1e-6)

    # Odd-sized input exercises the single-block ragged path.
    x2 = jax.random.normal(jax.random.PRNGKey(1), (3, 5, 7), dtype=jnp.float32)
    y2 = jax.block_until_ready(constant_scalar(x2, constant=factor, bias=bias))
    y2_ref = factor * x2 + bias
    assert y2.shape == x2.shape and y2.dtype == x2.dtype
    assert jnp.allclose(y2, y2_ref, atol=1e-6, rtol=1e-6)

    # Default-argument path (factor=1, bias=0) behaves as identity.
    y3 = jax.block_until_ready(constant_scalar(x))
    assert jnp.allclose(y3, x, atol=1e-6, rtol=1e-6)

    print("KERNEL_OK")
</pallas_src>

<mosaic_0001>
module attributes {stable_mosaic.version = 11 : i64} {
  func.func @kernel(%arg0: i32, %arg1: memref<1x2048xf32, #tpu.memory_space<vmem>>, %arg2: memref<1x2048xf32, #tpu.memory_space<vmem>>) attributes {dimension_semantics = [#tpu.dimension_semantics<parallel>], iteration_bounds = array<i64: 1>, scalar_prefetch = 0 : i64, scratch_operands = 0 : i64, tpu.core_type = #tpu.core_type<tc>, window_params = [{transform_indices = @transform_0, window_bounds = array<i64: 1, 2048>}, {transform_indices = @transform_1, window_bounds = array<i64: 1, 2048>}]} {
    %c0 = arith.constant 0 : index
    %c0_0 = arith.constant 0 : index
    %0 = vector.load %arg1[%c0, %c0_0] : memref<1x2048xf32, #tpu.memory_space<vmem>>, vector<1x2048xf32>
    %cst = arith.constant 2.500000e+00 : f32
    %1 = vector.broadcast %cst : f32 to vector<1x2048xf32>
    %2 = arith.mulf %0, %1 : vector<1x2048xf32>
    %cst_1 = arith.constant 7.500000e-01 : f32
    %3 = vector.broadcast %cst_1 : f32 to vector<1x2048xf32>
    %4 = arith.addf %2, %3 : vector<1x2048xf32>
    %c0_2 = arith.constant 0 : index
    %c0_3 = arith.constant 0 : index
    %5 = vector.load %arg2[%c0_2, %c0_3] : memref<1x2048xf32, #tpu.memory_space<vmem>>, vector<1x2048xf32>
    tpu.vector_store %arg2[%c0_2, %c0_3], %4 {strides = array<i32>} : memref<1x2048xf32, #tpu.memory_space<vmem>>, vector<1x2048xf32>,
    return
  }
  func.func @transform_0(%arg0: i32) -> (i32, i32) {
    %c0_i32 = arith.constant 0 : i32
    %c0_i32_0 = arith.constant 0 : i32
    return %arg0, %c0_i32 : i32, i32
  }
  func.func @transform_1(%arg0: i32) -> (i32, i32) {
    %c0_i32 = arith.constant 0 : i32
    %c0_i32_0 = arith.constant 0 : i32
    return %arg0, %c0_i32 : i32, i32
  }
}

</mosaic_0001>

<bundles_post_ra>
// kernel: tpu_custom_call.1
= control target key start
LH: loop header
LB: loop body
LE: loop exit
PB: predicated region body
PF: predicated region fallthrough
CT: control target
= control target key end

     0   :  { %6 = vsyncpa [#allocation3], 0  ;;  %s130_s0 = inlined_call_operand.hbm [shape: f32[1,2048], index: 0, kind: input, shape index: {}]   ;;  %s131_s1 = inlined_call_operand.hbm [shape: f32[1,2048], index: 1, kind: output, shape index: {}]  }
   0x1   :  { %7 = vsyncpa [#allocation4], 0  ;;  %s94_s6 = smov [#allocation2]   ;;  %s46_s10 = scalar_lea.hbm %s130_s0, 256 }
   0x2   :  { %s14_s7 = sshll.u32 %s94_s6, 4  ;;  %p47_p0 = scmp.ne.s32.totalorder %s130_s0, %s46_s10  ;;  %s15_s7 = int_to_ptr.vmem [resolvable:$true] %s14_s7 }
   0x3   :  { %p50_p1 = scmp.lt.u32.totalorder %s46_s10, %s130_s0 }
   0x5   :  { %p52_p2 = pnand %p50_p1, %p47_p0 }
   0x7   :  { %55 = shalt.err (!%p52_p2)
}
   0x8   :  { %s56_s15 = scalar_lea.vmem %s15_s7, 256  ;;  %p61_p4 = scmp.lt.s32.totalorder %s15_s7, %s15_s7 }
   0x9   :  { %p57_p3 = scmp.ne.s32.totalorder %s15_s7, %s56_s15  ;;  %p62_p5 = scmp.lt.s32.totalorder %s56_s15, %s56_s15 }
   0xb   :  { %p63_p6 = por %p62_p5, %p61_p4 }
   0xd   :  { %p64_p7 = pnand %p63_p6, %p57_p3 }
   0xf   :  { %67 = shalt.err (!%p64_p7)
}
  0x10   :  { %17 = dma.hbm_to_vmem [thread:$0]  %s130_s0, 256, %s15_s7, [#allocation3]  }
  0x11   :  { %90 = dma.done.wait [#allocation3], 256  }
  0x12   :  { %91 = vsyncadd [#allocation3], 4294967040  ;;  %v21_v0 = vld [vmem:[#allocation2] sm:$0xff]  ;;  %v22_v1 = vld [vmem:[#allocation2 + $0x8] sm:$0xff]  ;;  %s95_s18 = smov [#allocation5]  }
  0x13   :  { %s35_s19 = sshll.u32 %s95_s18, 4  ;;  %v23_v2 = vmul.f32 2.5, %v21_v0  ;;  %v24_v3 = vmul.f32 2.5, %v22_v1  ;;  %s36_s19 = int_to_ptr.vmem [resolvable:$true] %s35_s19 }
  0x14   :  { %s68_s20 = scalar_lea.vmem %s36_s19, 256  ;;  %p73_p9 = scmp.lt.s32.totalorder %s36_s19, %s36_s19 }
  0x15   :  { %v25_v4 = vadd.f32 0.75, %v23_v2  ;;  %v26_v5 = vadd.f32 0.75, %v24_v3  ;;  %p69_p8 = scmp.ne.s32.totalorder %s36_s19, %s68_s20  ;;  %p74_p10 = scmp.lt.s32.totalorder %s68_s20, %s68_s20 }
  0x17   :  { %27 = vst [vmem:[#allocation5] sm:$0xff] %v25_v4  ;;  %28 = vst [vmem:[#allocation5 + $0x8] sm:$0xff] %v26_v5  ;;  %p75_p11 = por %p74_p10, %p73_p9 }
  0x19   :  { %p76_p12 = pnand %p75_p11, %p69_p8 }
  0x1b   :  { %79 = shalt.err (!%p76_p12)
}
  0x1c   :  { %s80_s22 = scalar_lea.hbm %s131_s1, 256 }
  0x1d   :  { %p81_p13 = scmp.ne.s32.totalorder %s131_s1, %s80_s22  ;;  %p84_p0 = scmp.lt.u32.totalorder %s80_s22, %s131_s1 }
  0x1f   :  { %p86_p1 = pnand %p84_p0, %p81_p13 }
  0x21   :  { %89 = shalt.err (!%p86_p1)
}
  0x22   :  { %38 = dma.vmem_to_hbm [thread:$0]  %s36_s19, 256, %s131_s1, [#allocation4]  }
  0x23   :  { %92 = dma.done.wait [#allocation4], 256  }
  0x24   :  { %93 = vsyncadd [#allocation4], 4294967040 }
  0x25   :  { %42 = vsyncpa [#allocation3], 1 }
  0x26   :  { %43 = vsyncpa [#allocation4], 1 }

</bundles_post_ra>
